<compile_context>
chip_gen: v7x
topology: tpu7x:2x2x1
jax: 0.10.0
libtpu: 0.0.40
codegen_flags: <defaults>
</compile_context>

<pallas_src>
import jax
import jax.numpy as jnp
from jax import lax
from jax.experimental import pallas as pl
from jax.experimental.pallas import tpu as pltpu


# --------------------------------------------------------------------------
# Acklam's inverse standard-normal CDF (rational approximations).
# Central region: rational in (u - 0.5)^2.
# Tails:          rational in q = sqrt(-2*log(r)), r = min(u, 1-u)
#                 -> one log + one sqrt (single dependent EUP pair).
# One shared approximate reciprocal for the selected denominator.
# --------------------------------------------------------------------------
_A = (-3.969683028665376e+01, 2.209460984245205e+02, -2.759285104469687e+02,
      1.383577518672690e+02, -3.066479806614716e+01, 2.506628277459239e+00)
_B = (-5.447609879822406e+01, 1.615858368580409e+02, -1.556989798598866e+02,
      6.680131188771972e+01, -1.328068155288572e+01)
_C = (-7.784894002430293e-03, -3.223964580411365e-01, -2.400758277161838e+00,
      -2.549732539343734e+00, 4.374664141464968e+00, 2.938163982698783e+00)
_D = (7.784695709041462e-03, 3.224671290700398e-01, 2.445134137142996e+00,
      3.754408661907416e+00)
_P_LOW = 0.02425  # central region is (_P_LOW, 1 - _P_LOW)


def _inv_normal_cdf(u):
    """u (f32, strictly inside (0,1)) -> z ~ N(0,1) quantile (f32)."""
    f32 = jnp.float32
    # --- central region ---
    y = u - f32(0.5)
    s = y * y
    num_c = y * (((((f32(_A[0]) * s + f32(_A[1])) * s + f32(_A[2])) * s
                   + f32(_A[3])) * s + f32(_A[4])) * s + f32(_A[5]))
    den_c = (((((f32(_B[0]) * s + f32(_B[1])) * s + f32(_B[2])) * s
               + f32(_B[3])) * s + f32(_B[4])) * s + f32(1.0))
    # --- tails (r >= 2^-24 because u comes from 23-bit uniforms, so log/sqrt
    #     are always finite) ---
    r = jnp.minimum(u, f32(1.0) - u)
    q = jnp.sqrt(f32(-2.0) * jnp.log(r))
    num_t = (((((f32(_C[0]) * q + f32(_C[1])) * q + f32(_C[2])) * q
               + f32(_C[3])) * q + f32(_C[4])) * q + f32(_C[5]))
    den_t = ((((f32(_D[0]) * q + f32(_D[1])) * q + f32(_D[2])) * q
              + f32(_D[3])) * q + f32(1.0))
    # lower tail (y < 0) keeps the (negative) value, upper tail is mirrored
    num_t = jnp.where(y < 0, num_t, -num_t)
    # select once, divide once (approx reciprocal -> EUP slot, off the VALU)
    central = jnp.abs(y) <= f32(0.5 - _P_LOW)
    num = jnp.where(central, num_c, num_t)
    den = jnp.where(central, den_c, den_t)
    return num * pl.reciprocal(den, approx=True)


# --------------------------------------------------------------------------
# Pallas kernel: counter hash -> 2 uniforms -> 2 N(0,1) samples.
# Only the two consumed values are computed and stored.
# --------------------------------------------------------------------------
def _randn_pair_kernel(seed_ref, out_ref):
    # seed_ref: SMEM (1,) int32 ; out_ref: VMEM (1, 2) f32
    seed = seed_ref[0]
    idx = lax.broadcasted_iota(jnp.int32, out_ref.shape, 1)      # [[0, 1]]
    # golden-ratio counter step, then murmur3 fmix32 finalizer.
    # int32 mul/xor/logical-shift are bit-identical to uint32 arithmetic
    # (two's-complement wraparound is the intended behavior).
    h = idx * jnp.int32(-1640531527) + seed                       # 0x9E3779B9
    h = h ^ lax.shift_right_logical(h, 16)
    h = h * jnp.int32(-2048144789)                                 # 0x85EBCA6B
    h = h ^ lax.shift_right_logical(h, 13)
    h = h * jnp.int32(-1028477387)                                 # 0xC2B2AE35
    h = h ^ lax.shift_right_logical(h, 16)
    # top 23 bits -> uniform strictly inside (0,1): u in [2^-24, 1 - 2^-24]
    hi = lax.shift_right_logical(h, 9)
    u = (hi.astype(jnp.float32) + jnp.float32(0.5)) * jnp.float32(1.0 / 8388608.0)
    out_ref[...] = _inv_normal_cdf(u)


_COST = pl.CostEstimate(flops=2 * 64, transcendentals=2 * 4,
                        bytes_accessed=4 + 2 * 4)


@jax.jit
def _draw_two_normals(seed_arr):
    """seed_arr: (1,) int32 (traced) -> two (1,) f32 N(0,1) draws.

    Single dispatch: one tiny custom call, pair split fused inside the jit.
    """
    pair = pl.pallas_call(
        _randn_pair_kernel,
        out_shape=jax.ShapeDtypeStruct((1, 2), jnp.float32),
        in_specs=[pl.BlockSpec(memory_space=pltpu.MemorySpace.SMEM)],
        out_specs=pl.BlockSpec(memory_space=pltpu.MemorySpace.VMEM),
        cost_estimate=_COST,
    )(seed_arr)
    pair = pair.reshape((2,))
    return pair[0:1], pair[1:2]


# --------------------------------------------------------------------------
# AISystem.forward equivalent.
# --------------------------------------------------------------------------
def ai_system_forward(visual_input, auditory_input, tactile_input,
                      biometric_input, *, seed=0):
    # The reference forward() ignores every input — we do too, on purpose.
    del visual_input, auditory_input, tactile_input, biometric_input

    seed_arr = jnp.asarray(seed, dtype=jnp.int32).reshape((1,))
    decision_output, hippocampus_output = _draw_two_normals(seed_arr)

    # Fixed (non-tensor) emotion scores — plain Python dict, as in PyTorch.
    amygdala_output = {'happiness': 0.2, 'sadness': 0.3, 'anger': 0.1,
                       'fear': 0.4, 'surprise': 0.0}
    return decision_output, amygdala_output, hippocampus_output


if __name__ == "__main__":
    key = jax.random.PRNGKey(0)
    k1, k2, k3, k4 = jax.random.split(key, 4)
    visual = jax.random.normal(k1, (2, 4, 16, 16), dtype=jnp.float32)   # NCHW
    auditory = jax.random.normal(k2, (2, 8, 32), dtype=jnp.float32)     # [B,C,T]
    tactile = jax.random.normal(k3, (2, 16), dtype=jnp.float32)         # [B,F]
    biometric = jax.random.normal(k4, (2, 4), dtype=jnp.float32)        # [B,F]

    decision, amygdala, hippocampus = ai_system_forward(
        visual, auditory, tactile, biometric, seed=0)
    # Block on both outputs at once (single host sync).
    jax.block_until_ready((decision, hippocampus))

    assert decision.shape == (1,) and decision.dtype == jnp.float32
    assert hippocampus.shape == (1,) and hippocampus.dtype == jnp.float32
    assert bool(jnp.all(jnp.isfinite(decision)))
    assert bool(jnp.all(jnp.isfinite(hippocampus)))
    # Different counters + fmix32 must give distinct draws.
    assert float(decision[0]) != float(hippocampus[0])
    assert isinstance(amygdala, dict) and len(amygdala) == 5

    print("KERNEL_OK")
</pallas_src>

<mosaic_0001>
module attributes {stable_mosaic.version = 11 : i64} {
  func.func @_randn_pair_kernel(%arg0: memref<1xi32, #tpu.memory_space<smem>>, %arg1: memref<1x2xf32, #tpu.memory_space<vmem>>) attributes {dimension_semantics = [], scalar_prefetch = 0 : i64, scratch_operands = 0 : i64, tpu.core_type = #tpu.core_type<tc>} {
    %c0 = arith.constant 0 : index
    %0 = memref.load %arg0[%c0] : memref<1xi32, #tpu.memory_space<smem>>
    %1 = tpu.iota {dimensions = array<i32: 1>} : vector<1x2xi32>
    %c-1640531527_i32 = arith.constant -1640531527 : i32
    %2 = vector.broadcast %c-1640531527_i32 : i32 to vector<1x2xi32>
    %3 = arith.muli %1, %2 : vector<1x2xi32>
    %4 = vector.broadcast %0 : i32 to vector<1x2xi32>
    %5 = arith.addi %3, %4 : vector<1x2xi32>
    %c16_i32 = arith.constant 16 : i32
    %6 = vector.broadcast %c16_i32 : i32 to vector<1x2xi32>
    %7 = arith.shrui %5, %6 : vector<1x2xi32>
    %8 = arith.xori %5, %7 : vector<1x2xi32>
    %c-2048144789_i32 = arith.constant -2048144789 : i32
    %9 = vector.broadcast %c-2048144789_i32 : i32 to vector<1x2xi32>
    %10 = arith.muli %8, %9 : vector<1x2xi32>
    %c13_i32 = arith.constant 13 : i32
    %11 = vector.broadcast %c13_i32 : i32 to vector<1x2xi32>
    %12 = arith.shrui %10, %11 : vector<1x2xi32>
    %13 = arith.xori %10, %12 : vector<1x2xi32>
    %c-1028477387_i32 = arith.constant -1028477387 : i32
    %14 = vector.broadcast %c-1028477387_i32 : i32 to vector<1x2xi32>
    %15 = arith.muli %13, %14 : vector<1x2xi32>
    %c16_i32_0 = arith.constant 16 : i32
    %16 = vector.broadcast %c16_i32_0 : i32 to vector<1x2xi32>
    %17 = arith.shrui %15, %16 : vector<1x2xi32>
    %18 = arith.xori %15, %17 : vector<1x2xi32>
    %c9_i32 = arith.constant 9 : i32
    %19 = vector.broadcast %c9_i32 : i32 to vector<1x2xi32>
    %20 = arith.shrui %18, %19 : vector<1x2xi32>
    %21 = arith.sitofp %20 : vector<1x2xi32> to vector<1x2xf32>
    %cst = arith.constant 5.000000e-01 : f32
    %22 = vector.broadcast %cst : f32 to vector<1x2xf32>
    %23 = arith.addf %21, %22 : vector<1x2xf32>
    %cst_1 = arith.constant 1.1920929E-7 : f32
    %24 = vector.broadcast %cst_1 : f32 to vector<1x2xf32>
    %25 = arith.mulf %23, %24 : vector<1x2xf32>
    %cst_2 = arith.constant 5.000000e-01 : f32
    %26 = vector.broadcast %cst_2 : f32 to vector<1x2xf32>
    %27 = arith.subf %25, %26 : vector<1x2xf32>
    %28 = arith.mulf %27, %27 : vector<1x2xf32>
    %cst_3 = arith.constant -39.6968307 : f32
    %29 = vector.broadcast %cst_3 : f32 to vector<1x2xf32>
    %30 = arith.mulf %29, %28 : vector<1x2xf32>
    %cst_4 = arith.constant 220.946106 : f32
    %31 = vector.broadcast %cst_4 : f32 to vector<1x2xf32>
    %32 = arith.addf %30, %31 : vector<1x2xf32>
    %33 = arith.mulf %32, %28 : vector<1x2xf32>
    %cst_5 = arith.constant -275.928497 : f32
    %34 = vector.broadcast %cst_5 : f32 to vector<1x2xf32>
    %35 = arith.addf %33, %34 : vector<1x2xf32>
    %36 = arith.mulf %35, %28 : vector<1x2xf32>
    %cst_6 = arith.constant 138.357758 : f32
    %37 = vector.broadcast %cst_6 : f32 to vector<1x2xf32>
    %38 = arith.addf %36, %37 : vector<1x2xf32>
    %39 = arith.mulf %38, %28 : vector<1x2xf32>
    %cst_7 = arith.constant -30.6647987 : f32
    %40 = vector.broadcast %cst_7 : f32 to vector<1x2xf32>
    %41 = arith.addf %39, %40 : vector<1x2xf32>
    %42 = arith.mulf %41, %28 : vector<1x2xf32>
    %cst_8 = arith.constant 2.50662827 : f32
    %43 = vector.broadcast %cst_8 : f32 to vector<1x2xf32>
    %44 = arith.addf %42, %43 : vector<1x2xf32>
    %45 = arith.mulf %27, %44 : vector<1x2xf32>
    %cst_9 = arith.constant -54.4760971 : f32
    %46 = vector.broadcast %cst_9 : f32 to vector<1x2xf32>
    %47 = arith.mulf %46, %28 : vector<1x2xf32>
    %cst_10 = arith.constant 161.585831 : f32
    %48 = vector.broadcast %cst_10 : f32 to vector<1x2xf32>
    %49 = arith.addf %47, %48 : vector<1x2xf32>
    %50 = arith.mulf %49, %28 : vector<1x2xf32>
    %cst_11 = arith.constant -155.698975 : f32
    %51 = vector.broadcast %cst_11 : f32 to vector<1x2xf32>
    %52 = arith.addf %50, %51 : vector<1x2xf32>
    %53 = arith.mulf %52, %28 : vector<1x2xf32>
    %cst_12 = arith.constant 66.8013153 : f32
    %54 = vector.broadcast %cst_12 : f32 to vector<1x2xf32>
    %55 = arith.addf %53, %54 : vector<1x2xf32>
    %56 = arith.mulf %55, %28 : vector<1x2xf32>
    %cst_13 = arith.constant -13.2806816 : f32
    %57 = vector.broadcast %cst_13 : f32 to vector<1x2xf32>
    %58 = arith.addf %56, %57 : vector<1x2xf32>
    %59 = arith.mulf %58, %28 : vector<1x2xf32>
    %cst_14 = arith.constant 1.000000e+00 : f32
    %60 = vector.broadcast %cst_14 : f32 to vector<1x2xf32>
    %61 = arith.addf %59, %60 : vector<1x2xf32>
    %cst_15 = arith.constant 1.000000e+00 : f32
    %62 = vector.broadcast %cst_15 : f32 to vector<1x2xf32>
    %63 = arith.subf %62, %25 : vector<1x2xf32>
    %64 = arith.minimumf %25, %63 : vector<1x2xf32>
    %65 = math.log %64 : vector<1x2xf32>
    %cst_16 = arith.constant -2.000000e+00 : f32
    %66 = vector.broadcast %cst_16 : f32 to vector<1x2xf32>
    %67 = arith.mulf %66, %65 : vector<1x2xf32>
    %68 = math.sqrt %67 : vector<1x2xf32>
    %cst_17 = arith.constant -0.0077848942 : f32
    %69 = vector.broadcast %cst_17 : f32 to vector<1x2xf32>
    %70 = arith.mulf %69, %68 : vector<1x2xf32>
    %cst_18 = arith.constant -0.322396457 : f32
    %71 = vector.broadcast %cst_18 : f32 to vector<1x2xf32>
    %72 = arith.addf %70, %71 : vector<1x2xf32>
    %73 = arith.mulf %72, %68 : vector<1x2xf32>
    %cst_19 = arith.constant -2.40075827 : f32
    %74 = vector.broadcast %cst_19 : f32 to vector<1x2xf32>
    %75 = arith.addf %73, %74 : vector<1x2xf32>
    %76 = arith.mulf %75, %68 : vector<1x2xf32>
    %cst_20 = arith.constant -2.54973245 : f32
    %77 = vector.broadcast %cst_20 : f32 to vector<1x2xf32>
    %78 = arith.addf %76, %77 : vector<1x2xf32>
    %79 = arith.mulf %78, %68 : vector<1x2xf32>
    %cst_21 = arith.constant 4.37466431 : f32
    %80 = vector.broadcast %cst_21 : f32 to vector<1x2xf32>
    %81 = arith.addf %79, %80 : vector<1x2xf32>
    %82 = arith.mulf %81, %68 : vector<1x2xf32>
    %cst_22 = arith.constant 2.938164 : f32
    %83 = vector.broadcast %cst_22 : f32 to vector<1x2xf32>
    %84 = arith.addf %82, %83 : vector<1x2xf32>
    %cst_23 = arith.constant 0.00778469583 : f32
    %85 = vector.broadcast %cst_23 : f32 to vector<1x2xf32>
    %86 = arith.mulf %85, %68 : vector<1x2xf32>
    %cst_24 = arith.constant 0.322467119 : f32
    %87 = vector.broadcast %cst_24 : f32 to vector<1x2xf32>
    %88 = arith.addf %86, %87 : vector<1x2xf32>
    %89 = arith.mulf %88, %68 : vector<1x2xf32>
    %cst_25 = arith.constant 2.44513416 : f32
    %90 = vector.broadcast %cst_25 : f32 to vector<1x2xf32>
    %91 = arith.addf %89, %90 : vector<1x2xf32>
    %92 = arith.mulf %91, %68 : vector<1x2xf32>
    %cst_26 = arith.constant 3.7544086 : f32
    %93 = vector.broadcast %cst_26 : f32 to vector<1x2xf32>
    %94 = arith.addf %92, %93 : vector<1x2xf32>
    %95 = arith.mulf %94, %68 : vector<1x2xf32>
    %cst_27 = arith.constant 1.000000e+00 : f32
    %96 = vector.broadcast %cst_27 : f32 to vector<1x2xf32>
    %97 = arith.addf %95, %96 : vector<1x2xf32>
    %cst_28 = arith.constant 0.000000e+00 : f32
    %98 = vector.broadcast %cst_28 : f32 to vector<1x2xf32>
    %99 = arith.cmpf olt, %27, %98 : vector<1x2xf32>
    %cst_29 = arith.constant 0.000000e+00 : f32
    %100 = vector.broadcast %cst_29 : f32 to vector<1x2xf32>
    %101 = arith.subf %100, %84 : vector<1x2xf32>
    %102 = arith.select %99, %84, %101 : vector<1x2xi1>, vector<1x2xf32>
    %103 = math.absf %27 : vector<1x2xf32>
    %cst_30 = arith.constant 4.757500e-01 : f32
    %104 = vector.broadcast %cst_30 : f32 to vector<1x2xf32>
    %105 = arith.cmpf ole, %103, %104 : vector<1x2xf32>
    %106 = arith.select %105, %45, %102 : vector<1x2xi1>, vector<1x2xf32>
    %107 = arith.select %105, %61, %97 : vector<1x2xi1>, vector<1x2xf32>
    %108 = tpu.reciprocal %107 {approx = true} : vector<1x2xf32> -> vector<1x2xf32>
    %109 = arith.mulf %106, %108 : vector<1x2xf32>
    %c0_31 = arith.constant 0 : index
    %c0_32 = arith.constant 0 : index
    %110 = vector.load %arg1[%c0_31, %c0_32] : memref<1x2xf32, #tpu.memory_space<vmem>>, vector<1x2xf32>
    tpu.vector_store %arg1[%c0_31, %c0_32], %109 {strides = array<i32>} : memref<1x2xf32, #tpu.memory_space<vmem>>, vector<1x2xf32>,
    return
  }
}

</mosaic_0001>

<bundles_post_ra>
// kernel: _draw_two_normals.1
= control target key start
LH: loop header
LB: loop body
LE: loop exit
PB: predicated region body
PF: predicated region fallthrough
CT: control target
= control target key end

     0   :  { %v10_v0 = vlaneseq  ;;  %vm89_vm4 = vcmask 8192   ;;  %s126_s0 = inlined_call_operand.<no memory space> [shape: s32[1], index: 0, kind: input, shape index: {}]   ;;  %s127_s1 = inlined_call_operand.vmem [shape: f32[1,2], index: 1, kind: output, shape index: {}]  }
   0x1   :  { %v13_v2 = vstv %s126_s0 }
   0x2   :  { %v11_v1 = vand.u32 127, %v10_v0 }
   0x4   :  { %v12_v3 = vmul.u32 2654435769, %v11_v1 }
   0x6   :  { %v14_v4 = vadd.s32 %v13_v2, %v12_v3 }
   0x8   :  { %v15_v5 = vshrl.u32 %v14_v4, 16 }
   0xa   :  { %v16_v6 = vxor.u32 %v15_v5, %v14_v4 }
   0xc   :  { %v17_v7 = vmul.u32 2246822507, %v16_v6 }
   0xe   :  { %v18_v8 = vshrl.u32 %v17_v7, 13 }
  0x10   :  { %v19_v9 = vxor.u32 %v18_v8, %v17_v7 }
  0x12   :  { %v20_v10 = vmul.u32 3266489909, %v19_v9 }
  0x14   :  { %v21_v11 = vshrl.u32 %v20_v10, 16 }
  0x16   :  { %v22_v12 = vxor.u32 %v21_v11, %v20_v10 }
  0x18   :  { %v23_v13 = vshrl.u32 %v22_v12, 9 }
  0x1a   :  { %v24_v14 = vcvt.s32.f32 %v23_v13 }
  0x1c   :  { %v25_v15 = vadd.f32 0.5, %v24_v14 }
  0x1e   :  { %v26_v16 = vmul.f32 1.1920929e-07, %v25_v15 }
  0x20   :  { %v50_v17 = vsub.f32 1.0, %v26_v16  ;;  %v95_v18 = vadd.f32 -0.5, %v26_v16 }
  0x22   :  { %v51_v19 = vmin.f32 %v26_v16, %v50_v17  ;;  %v28_v20 = vmul.f32 %v95_v18, %v95_v18  ;;  %v83_v56 = vand.u32 2147483647, %v95_v18  ;;  %vm80_vm3 = vcmp.lt.f32.partialorder %v95_v18, 0.0 }
  0x24   :  { %96 = vlog2.f32 %v51_v19  ;;  %v40_v21 = vmul.f32 -54.476097, %v28_v20  ;;  %v29_v24 = vmul.f32 -39.69683, %v28_v20  ;;  %vm115_vm2 = vcmp.le.f32.partialorder %v83_v56, 0.47575 }
  0x26   :  { %v41_v23 = vadd.f32 161.58583, %v40_v21  ;;  %v30_v28 = vadd.f32 220.9461, %v29_v24 }
  0x28   :  { %v42_v27 = vmul.f32 %v41_v23, %v28_v20  ;;  %v31_v30 = vmul.f32 %v30_v28, %v28_v20 }
  0x2a   :  { %v43_v29 = vadd.f32 -155.69897, %v42_v27  ;;  %v32_v32 = vadd.f32 -275.9285, %v31_v30 }
  0x2c   :  { %v44_v31 = vmul.f32 %v43_v29, %v28_v20  ;;  %v33_v37 = vmul.f32 %v32_v32, %v28_v20 }
  0x2e   :  { %v97_v22 = vpop.eup %96  ;;  %v45_v35 = vadd.f32 66.801315, %v44_v31  ;;  %v34_v43 = vadd.f32 138.35776, %v33_v37 }
  0x2f   :  { %v53_v25 = vmul.f32 0.6931472, %v97_v22 }
  0x30   :  { %v46_v40 = vmul.f32 %v45_v35, %v28_v20  ;;  %v35_v49 = vmul.f32 %v34_v43, %v28_v20 }
  0x31   :  { %v54_v26 = vmul.f32 -2.0, %v53_v25 }
  0x32   :  { %v47_v46 = vadd.f32 -13.280682, %v46_v40  ;;  %v36_v55 = vadd.f32 -30.664799, %v35_v49 }
  0x33   :  { %98 = vrsqrt.f32 %v54_v26  ;;  %vm57_vm0 = vcmp.eq.f32.partialorder %v54_v26, inf  ;;  %v60_v34 = vand.u32 2147483648, %v54_v26  ;;  %vm59_vm1 = vcmp.eq.f32.partialorder %v54_v26, 0.0 }
  0x34   :  { %v48_v52 = vmul.f32 %v47_v46, %v28_v20  ;;  %v37_v62 = vmul.f32 %v36_v55, %v28_v20 }
  0x36   :  { %v49_v59 = vadd.f32 1.0, %v48_v52  ;;  %v38_v4 = vadd.f32 2.5066283, %v37_v62 }
  0x38   :  { %v39_v7 = vmul.f32 %v95_v18, %v38_v4 }
  0x3d   :  { %v99_v33 = vpop.eup %98 }
  0x3e   :  { %v56_v36 = vmul.f32 %v99_v33, %v54_v26 }
  0x40   :  { %v58_v38 = vsel %vm57_vm0, %v54_v26, %v56_v36 }
  0x41   :  { %v61_v39 = vsel %vm59_vm1, %v60_v34, %v58_v38 }
  0x42   :  { %v62_v41 = vmul.f32 -0.007784894, %v61_v39  ;;  %v72_v42 = vmul.f32 0.007784696, %v61_v39 }
  0x44   :  { %v63_v44 = vadd.f32 -0.32239646, %v62_v41  ;;  %v73_v45 = vadd.f32 0.32246712, %v72_v42 }
  0x46   :  { %v64_v47 = vmul.f32 %v63_v44, %v61_v39  ;;  %v74_v48 = vmul.f32 %v73_v45, %v61_v39 }
  0x48   :  { %v65_v50 = vadd.f32 -2.4007583, %v64_v47  ;;  %v75_v51 = vadd.f32 2.4451342, %v74_v48 }
  0x4a   :  { %v66_v53 = vmul.f32 %v65_v50, %v61_v39  ;;  %v76_v54 = vmul.f32 %v75_v51, %v61_v39 }
  0x4c   :  { %v67_v57 = vadd.f32 -2.5497324, %v66_v53  ;;  %v77_v58 = vadd.f32 3.7544086, %v76_v54 }
  0x4e   :  { %v68_v60 = vmul.f32 %v67_v57, %v61_v39  ;;  %v78_v61 = vmul.f32 %v77_v58, %v61_v39 }
  0x50   :  { %v69_v0 = vadd.f32 4.3746643, %v68_v60  ;;  %v79_v1 = vadd.f32 1.0, %v78_v61 }
  0x52   :  { %v70_v2 = vmul.f32 %v69_v0, %v61_v39  ;;  %v86_v3 = vsel %vm115_vm2, %v49_v59, %v79_v1 }
  0x53   :  { %100 = vrcp.f32 %v86_v3 }
  0x54   :  { %v71_v5 = vadd.f32 2.938164, %v70_v2 }
  0x56   :  { %v81_v6 = vsub.f32 0.0, %v71_v5 }
  0x58   :  { %v82_v8 = vsel %vm80_vm3, %v71_v5, %v81_v6 }
  0x59   :  { %v85_v9 = vsel %vm115_vm2, %v39_v7, %v82_v8 }
  0x5d   :  { %v101_v10 = vpop.eup %100 }
  0x5e   :  { %v88_v11 = vmul.f32 %v101_v10, %v85_v9 }
  0x60   :  { %90 = vst.msk [vmem:[%s127_s1] sm:$0x1] %vm89_vm4, %v88_v11 }

</bundles_post_ra>
